<compile_context>
chip_gen: v6e
topology: v6e:2x2x1
jax: 0.10.0
libtpu: 0.0.40
codegen_flags: <defaults>
</compile_context>

<pallas_src>
import jax
import jax.numpy as jnp
from jax.experimental import pallas as pl
from jax.experimental.pallas import tpu as pltpu

# Small, module-consistent shapes.
B, C, H, W = 2, 4, 16, 16          # image  [B, C, H, W]
P = 4                              # ViT patch size
NP = (H // P) * (W // P)           # patches per image
PATCH_DIM = C * P * P              # flattened patch dim
D = 32                             # hidden size
L = 8                              # prompt length
VOCAB = 64                         # prompt vocab
EPS = 1e-6


# --------------------------- fused model+loss kernel -------------------------
def fused_kernel(patches_ref, prompt_ref, target_ref, we_ref, w1_ref, b1_ref,
                 wd_ref, bd_ref, loss_ref, iou_ref):
    """ViT+BERT forward fused with dice/IoU; only two (1,1) scalars stored."""
    we = we_ref[...]
    w1 = w1_ref[...]
    b1 = b1_ref[...]
    wd = wd_ref[...]
    bd = bd_ref[...]

    nb = prompt_ref.shape[0]                 # batch size (static)
    npp = patches_ref.shape[0] // nb         # patches per sample (static)

    loss_acc = jnp.zeros((1, 1), jnp.float32)
    iou_acc = jnp.zeros((1, 1), jnp.float32)

    # Static unroll over the (tiny) batch: per-sample prompt broadcast and
    # per-sample dice / IoU reductions — no reshapes, no HBM traffic for
    # intermediates, no repeated [B*NP, D] prompt materialization.
    for b in range(nb):
        x = patches_ref[pl.ds(b * npp, npp), :]              # (NP, C*P*P) bf16
        pe = prompt_ref[pl.ds(b, 1), :]                      # (1, D) f32, bcast

        # bf16 MXU operands, f32 accumulation.
        e = jnp.dot(x, we, preferred_element_type=jnp.float32) + pe
        h = jnp.dot(e.astype(jnp.bfloat16), w1,
                    preferred_element_type=jnp.float32) + b1
        # TODO(synk): jax.nn.gelu uses the tanh approximation; PyTorch
        # nn.GELU defaults to exact erf (tiny numeric mismatch).
        h = jax.nn.gelu(h)
        logits = jnp.dot(h.astype(jnp.bfloat16), wd,
                         preferred_element_type=jnp.float32) + bd   # (NP, P*P)

        t = target_ref[pl.ds(b * npp, npp), :]               # (NP, P*P) f32
        p = jax.nn.sigmoid(logits)

        # Per-sample sums (pixel order is irrelevant for dice / IoU).
        inter = jnp.sum(jnp.sum(p * t, axis=1, keepdims=True),
                        axis=0, keepdims=True)
        psum = jnp.sum(jnp.sum(p, axis=1, keepdims=True),
                       axis=0, keepdims=True)
        tsum = jnp.sum(jnp.sum(t, axis=1, keepdims=True),
                       axis=0, keepdims=True)
        dice = 1.0 - (2.0 * inter + EPS) / (psum + tsum + EPS)

        pred = (logits > 0.0).astype(jnp.float32)   # == sigmoid(logits) > 0.5
        i2 = jnp.sum(jnp.sum(pred * t, axis=1, keepdims=True),
                     axis=0, keepdims=True)
        predsum = jnp.sum(jnp.sum(pred, axis=1, keepdims=True),
                          axis=0, keepdims=True)
        union = predsum + tsum - i2
        iou_b = (i2 + EPS) / (union + EPS)

        loss_acc = loss_acc + dice
        iou_acc = iou_acc + iou_b

    loss_ref[...] = loss_acc / nb      # mean reduction over the batch
    iou_ref[...] = iou_acc / nb


# ------------------------------- wrappers ------------------------------------
def _patchify(x):
    """[B, c, H, W] -> [B*NP, c*P*P]; identical rearrangement for image/target."""
    b, c = x.shape[0], x.shape[1]
    x = x.reshape(b, c, H // P, P, W // P, P)
    x = x.transpose(0, 2, 4, 1, 3, 5)
    return x.reshape(b * NP, c * P * P)


def model_with_loss(image, prompt_ids, target, params):
    """Mirrors ModelWithLoss.forward: returns (dice_loss_mean, mean_iou)."""
    embed_tbl, we, w1, b1, wd, bd = params

    # Glue: patchify image and target with the same pixel ordering; pool the
    # prompt embedding to [B, D] (broadcast per patch happens inside kernel).
    patches = _patchify(image).astype(jnp.bfloat16)            # [B*NP, C*P*P]
    tgt = _patchify(target).astype(jnp.float32)                # [B*NP, P*P]
    pe = jnp.take(embed_tbl, prompt_ids, axis=0).mean(axis=1)  # [B, D]

    vmem = pl.BlockSpec(memory_space=pltpu.MemorySpace.VMEM)
    loss, iou = pl.pallas_call(
        fused_kernel,
        out_shape=(jax.ShapeDtypeStruct((1, 1), jnp.float32),
                   jax.ShapeDtypeStruct((1, 1), jnp.float32)),
        in_specs=[vmem] * 8,
        out_specs=(vmem, vmem),
        # TODO(synk): at scaled-up B/H/W add a row-tile grid with
        # dimension_semantics=("parallel",) (2 TCs on v7x) and per-generation
        # VMEM-aware tile sizes (64 MiB physical on v7x vs 128 MiB v5e/v6e).
    )(patches, pe, tgt,
      we.astype(jnp.bfloat16), w1.astype(jnp.bfloat16), b1,
      wd.astype(jnp.bfloat16), bd)
    return loss[0, 0], iou[0, 0]


if __name__ == "__main__":
    key = jax.random.PRNGKey(0)
    k_img, k_prm, k_tgt, k_e, k_we, k_w1, k_wd = jax.random.split(key, 7)

    image = jax.random.normal(k_img, (B, C, H, W), jnp.float32)
    prompt_ids = jax.random.randint(k_prm, (B, L), 0, VOCAB, dtype=jnp.int32)
    target = (jax.random.uniform(k_tgt, (B, 1, H, W)) > 0.5).astype(jnp.float32)

    # Deterministic synthetic parameters (shapes implied by the forward pass).
    params = (
        0.02 * jax.random.normal(k_e, (VOCAB, D), jnp.float32),        # prompt embed
        0.02 * jax.random.normal(k_we, (PATCH_DIM, D), jnp.float32),   # patch embed
        0.02 * jax.random.normal(k_w1, (D, D), jnp.float32),           # MLP weight
        jnp.zeros((1, D), jnp.float32),                                # MLP bias
        0.02 * jax.random.normal(k_wd, (D, P * P), jnp.float32),       # decoder weight
        jnp.zeros((1, P * P), jnp.float32),                            # decoder bias
    )

    loss, iou = jax.jit(model_with_loss)(image, prompt_ids, target, params)
    jax.block_until_ready((loss, iou))
    print("KERNEL_OK")
</pallas_src>

<mosaic_0001>
module attributes {stable_mosaic.version = 11 : i64} {
  func.func @fused_kernel(%arg0: memref<32x64xbf16, #tpu.memory_space<vmem>>, %arg1: memref<2x32xf32, #tpu.memory_space<vmem>>, %arg2: memref<32x16xf32, #tpu.memory_space<vmem>>, %arg3: memref<64x32xbf16, #tpu.memory_space<vmem>>, %arg4: memref<32x32xbf16, #tpu.memory_space<vmem>>, %arg5: memref<1x32xf32, #tpu.memory_space<vmem>>, %arg6: memref<32x16xbf16, #tpu.memory_space<vmem>>, %arg7: memref<1x16xf32, #tpu.memory_space<vmem>>, %arg8: memref<1x1xf32, #tpu.memory_space<vmem>>, %arg9: memref<1x1xf32, #tpu.memory_space<vmem>>) attributes {dimension_semantics = [], scalar_prefetch = 0 : i64, scratch_operands = 0 : i64, tpu.core_type = #tpu.core_type<tc>} {
    %c0 = arith.constant 0 : index
    %c0_0 = arith.constant 0 : index
    %0 = vector.load %arg3[%c0, %c0_0] : memref<64x32xbf16, #tpu.memory_space<vmem>>, vector<64x32xbf16>
    %c0_1 = arith.constant 0 : index
    %c0_2 = arith.constant 0 : index
    %1 = vector.load %arg4[%c0_1, %c0_2] : memref<32x32xbf16, #tpu.memory_space<vmem>>, vector<32x32xbf16>
    %c0_3 = arith.constant 0 : index
    %c0_4 = arith.constant 0 : index
    %2 = vector.load %arg5[%c0_3, %c0_4] : memref<1x32xf32, #tpu.memory_space<vmem>>, vector<1x32xf32>
    %c0_5 = arith.constant 0 : index
    %c0_6 = arith.constant 0 : index
    %3 = vector.load %arg6[%c0_5, %c0_6] : memref<32x16xbf16, #tpu.memory_space<vmem>>, vector<32x16xbf16>
    %c0_7 = arith.constant 0 : index
    %c0_8 = arith.constant 0 : index
    %4 = vector.load %arg7[%c0_7, %c0_8] : memref<1x16xf32, #tpu.memory_space<vmem>>, vector<1x16xf32>
    %cst = arith.constant 0.000000e+00 : f32
    %5 = vector.broadcast %cst : f32 to vector<1x1xf32>
    %cst_9 = arith.constant 0.000000e+00 : f32
    %6 = vector.broadcast %cst_9 : f32 to vector<1x1xf32>
    %c0_10 = arith.constant 0 : index
    %c0_11 = arith.constant 0 : index
    %7 = vector.load %arg0[%c0_10, %c0_11] : memref<32x64xbf16, #tpu.memory_space<vmem>>, vector<16x64xbf16>
    %c0_12 = arith.constant 0 : index
    %c0_13 = arith.constant 0 : index
    %8 = vector.load %arg1[%c0_12, %c0_13] : memref<2x32xf32, #tpu.memory_space<vmem>>, vector<1x32xf32>
    %cst_14 = arith.constant dense<0.000000e+00> : vector<16x32xf32>
    %9 = tpu.matmul %7, %0, %cst_14 {dimension_numbers = #tpu.dot_dimension_numbers<[1], [0], [0], [1], [0, 0, 1, 1], [], []>} : vector<16x64xbf16>, vector<64x32xbf16>, vector<16x32xf32> -> vector<16x32xf32>
    %10 = vector.broadcast %8 : vector<1x32xf32> to vector<16x32xf32>
    %11 = arith.addf %9, %10 : vector<16x32xf32>
    %12 = arith.truncf %11 : vector<16x32xf32> to vector<16x32xbf16>
    %cst_15 = arith.constant dense<0.000000e+00> : vector<16x32xf32>
    %13 = tpu.matmul %12, %1, %cst_15 {dimension_numbers = #tpu.dot_dimension_numbers<[1], [0], [0], [1], [0, 0, 1, 1], [], []>} : vector<16x32xbf16>, vector<32x32xbf16>, vector<16x32xf32> -> vector<16x32xf32>
    %14 = vector.broadcast %2 : vector<1x32xf32> to vector<16x32xf32>
    %15 = arith.addf %13, %14 : vector<16x32xf32>
    %16 = arith.mulf %15, %15 : vector<16x32xf32>
    %17 = arith.mulf %15, %16 : vector<16x32xf32>
    %cst_16 = arith.constant 4.471500e-02 : f32
    %18 = vector.broadcast %cst_16 : f32 to vector<16x32xf32>
    %19 = arith.mulf %18, %17 : vector<16x32xf32>
    %20 = arith.addf %15, %19 : vector<16x32xf32>
    %cst_17 = arith.constant 0.797884583 : f32
    %21 = vector.broadcast %cst_17 : f32 to vector<16x32xf32>
    %22 = arith.mulf %21, %20 : vector<16x32xf32>
    %23 = math.tanh %22 : vector<16x32xf32>
    %cst_18 = arith.constant 1.000000e+00 : f32
    %24 = vector.broadcast %cst_18 : f32 to vector<16x32xf32>
    %25 = arith.addf %24, %23 : vector<16x32xf32>
    %cst_19 = arith.constant 5.000000e-01 : f32
    %26 = vector.broadcast %cst_19 : f32 to vector<16x32xf32>
    %27 = arith.mulf %26, %25 : vector<16x32xf32>
    %28 = arith.mulf %15, %27 : vector<16x32xf32>
    %29 = arith.truncf %28 : vector<16x32xf32> to vector<16x32xbf16>
    %cst_20 = arith.constant dense<0.000000e+00> : vector<16x16xf32>
    %30 = tpu.matmul %29, %3, %cst_20 {dimension_numbers = #tpu.dot_dimension_numbers<[1], [0], [0], [1], [0, 0, 1, 1], [], []>} : vector<16x32xbf16>, vector<32x16xbf16>, vector<16x16xf32> -> vector<16x16xf32>
    %31 = vector.broadcast %4 : vector<1x16xf32> to vector<16x16xf32>
    %32 = arith.addf %30, %31 : vector<16x16xf32>
    %c0_21 = arith.constant 0 : index
    %c0_22 = arith.constant 0 : index
    %33 = vector.load %arg2[%c0_21, %c0_22] : memref<32x16xf32, #tpu.memory_space<vmem>>, vector<16x16xf32>
    %34 = arith.negf %32 : vector<16x16xf32>
    %35 = math.exp %34 : vector<16x16xf32>
    %cst_23 = arith.constant 1.000000e+00 : f32
    %36 = vector.broadcast %cst_23 : f32 to vector<16x16xf32>
    %37 = arith.addf %36, %35 : vector<16x16xf32>
    %38 = arith.divf %36, %37 : vector<16x16xf32>
    %39 = arith.mulf %38, %33 : vector<16x16xf32>
    %cst_24 = arith.constant dense<0.000000e+00> : vector<16xf32>
    %40 = vector.multi_reduction <add>, %39, %cst_24 [1] : vector<16x16xf32> to vector<16xf32>
    %41 = vector.shape_cast %40 : vector<16xf32> to vector<16x1xf32>
    %cst_25 = arith.constant dense<0.000000e+00> : vector<1xf32>
    %42 = vector.multi_reduction <add>, %41, %cst_25 [0] : vector<16x1xf32> to vector<1xf32>
    %43 = vector.shape_cast %42 : vector<1xf32> to vector<1x1xf32>
    %cst_26 = arith.constant dense<0.000000e+00> : vector<16xf32>
    %44 = vector.multi_reduction <add>, %38, %cst_26 [1] : vector<16x16xf32> to vector<16xf32>
    %45 = vector.shape_cast %44 : vector<16xf32> to vector<16x1xf32>
    %cst_27 = arith.constant dense<0.000000e+00> : vector<1xf32>
    %46 = vector.multi_reduction <add>, %45, %cst_27 [0] : vector<16x1xf32> to vector<1xf32>
    %47 = vector.shape_cast %46 : vector<1xf32> to vector<1x1xf32>
    %cst_28 = arith.constant dense<0.000000e+00> : vector<16xf32>
    %48 = vector.multi_reduction <add>, %33, %cst_28 [1] : vector<16x16xf32> to vector<16xf32>
    %49 = vector.shape_cast %48 : vector<16xf32> to vector<16x1xf32>
    %cst_29 = arith.constant dense<0.000000e+00> : vector<1xf32>
    %50 = vector.multi_reduction <add>, %49, %cst_29 [0] : vector<16x1xf32> to vector<1xf32>
    %51 = vector.shape_cast %50 : vector<1xf32> to vector<1x1xf32>
    %cst_30 = arith.constant 2.000000e+00 : f32
    %52 = vector.broadcast %cst_30 : f32 to vector<1x1xf32>
    %53 = arith.mulf %52, %43 : vector<1x1xf32>
    %cst_31 = arith.constant 9.99999997E-7 : f32
    %54 = vector.broadcast %cst_31 : f32 to vector<1x1xf32>
    %55 = arith.addf %53, %54 : vector<1x1xf32>
    %56 = arith.addf %47, %51 : vector<1x1xf32>
    %cst_32 = arith.constant 9.99999997E-7 : f32
    %57 = vector.broadcast %cst_32 : f32 to vector<1x1xf32>
    %58 = arith.addf %56, %57 : vector<1x1xf32>
    %59 = arith.divf %55, %58 : vector<1x1xf32>
    %cst_33 = arith.constant 1.000000e+00 : f32
    %60 = vector.broadcast %cst_33 : f32 to vector<1x1xf32>
    %61 = arith.subf %60, %59 : vector<1x1xf32>
    %cst_34 = arith.constant 0.000000e+00 : f32
    %62 = vector.broadcast %cst_34 : f32 to vector<16x16xf32>
    %63 = arith.cmpf ogt, %32, %62 : vector<16x16xf32>
    %64 = arith.extui %63 : vector<16x16xi1> to vector<16x16xi32>
    %65 = arith.sitofp %64 : vector<16x16xi32> to vector<16x16xf32>
    %66 = arith.mulf %65, %33 : vector<16x16xf32>
    %cst_35 = arith.constant dense<0.000000e+00> : vector<16xf32>
    %67 = vector.multi_reduction <add>, %66, %cst_35 [1] : vector<16x16xf32> to vector<16xf32>
    %68 = vector.shape_cast %67 : vector<16xf32> to vector<16x1xf32>
    %cst_36 = arith.constant dense<0.000000e+00> : vector<1xf32>
    %69 = vector.multi_reduction <add>, %68, %cst_36 [0] : vector<16x1xf32> to vector<1xf32>
    %70 = vector.shape_cast %69 : vector<1xf32> to vector<1x1xf32>
    %cst_37 = arith.constant dense<0.000000e+00> : vector<16xf32>
    %71 = vector.multi_reduction <add>, %65, %cst_37 [1] : vector<16x16xf32> to vector<16xf32>
    %72 = vector.shape_cast %71 : vector<16xf32> to vector<16x1xf32>
    %cst_38 = arith.constant dense<0.000000e+00> : vector<1xf32>
    %73 = vector.multi_reduction <add>, %72, %cst_38 [0] : vector<16x1xf32> to vector<1xf32>
    %74 = vector.shape_cast %73 : vector<1xf32> to vector<1x1xf32>
    %75 = arith.addf %74, %51 : vector<1x1xf32>
    %76 = arith.subf %75, %70 : vector<1x1xf32>
    %cst_39 = arith.constant 9.99999997E-7 : f32
    %77 = vector.broadcast %cst_39 : f32 to vector<1x1xf32>
    %78 = arith.addf %70, %77 : vector<1x1xf32>
    %cst_40 = arith.constant 9.99999997E-7 : f32
    %79 = vector.broadcast %cst_40 : f32 to vector<1x1xf32>
    %80 = arith.addf %76, %79 : vector<1x1xf32>
    %81 = arith.divf %78, %80 : vector<1x1xf32>
    %82 = arith.addf %5, %61 : vector<1x1xf32>
    %83 = arith.addf %6, %81 : vector<1x1xf32>
    %c16 = arith.constant 16 : index
    %c0_41 = arith.constant 0 : index
    %84 = vector.load %arg0[%c16, %c0_41] : memref<32x64xbf16, #tpu.memory_space<vmem>>, vector<16x64xbf16>
    %c1 = arith.constant 1 : index
    %c0_42 = arith.constant 0 : index
    %85 = vector.load %arg1[%c1, %c0_42] : memref<2x32xf32, #tpu.memory_space<vmem>>, vector<1x32xf32>
    %cst_43 = arith.constant dense<0.000000e+00> : vector<16x32xf32>
    %86 = tpu.matmul %84, %0, %cst_43 {dimension_numbers = #tpu.dot_dimension_numbers<[1], [0], [0], [1], [0, 0, 1, 1], [], []>} : vector<16x64xbf16>, vector<64x32xbf16>, vector<16x32xf32> -> vector<16x32xf32>
    %87 = vector.broadcast %85 : vector<1x32xf32> to vector<16x32xf32>
    %88 = arith.addf %86, %87 : vector<16x32xf32>
    %89 = arith.truncf %88 : vector<16x32xf32> to vector<16x32xbf16>
    %cst_44 = arith.constant dense<0.000000e+00> : vector<16x32xf32>
    %90 = tpu.matmul %89, %1, %cst_44 {dimension_numbers = #tpu.dot_dimension_numbers<[1], [0], [0], [1], [0, 0, 1, 1], [], []>} : vector<16x32xbf16>, vector<32x32xbf16>, vector<16x32xf32> -> vector<16x32xf32>
    %91 = vector.broadcast %2 : vector<1x32xf32> to vector<16x32xf32>
    %92 = arith.addf %90, %91 : vector<16x32xf32>
    %93 = arith.mulf %92, %92 : vector<16x32xf32>
    %94 = arith.mulf %92, %93 : vector<16x32xf32>
    %cst_45 = arith.constant 4.471500e-02 : f32
    %95 = vector.broadcast %cst_45 : f32 to vector<16x32xf32>
    %96 = arith.mulf %95, %94 : vector<16x32xf32>
    %97 = arith.addf %92, %96 : vector<16x32xf32>
    %cst_46 = arith.constant 0.797884583 : f32
    %98 = vector.broadcast %cst_46 : f32 to vector<16x32xf32>
    %99 = arith.mulf %98, %97 : vector<16x32xf32>
    %100 = math.tanh %99 : vector<16x32xf32>
    %cst_47 = arith.constant 1.000000e+00 : f32
    %101 = vector.broadcast %cst_47 : f32 to vector<16x32xf32>
    %102 = arith.addf %101, %100 : vector<16x32xf32>
    %cst_48 = arith.constant 5.000000e-01 : f32
    %103 = vector.broadcast %cst_48 : f32 to vector<16x32xf32>
    %104 = arith.mulf %103, %102 : vector<16x32xf32>
    %105 = arith.mulf %92, %104 : vector<16x32xf32>
    %106 = arith.truncf %105 : vector<16x32xf32> to vector<16x32xbf16>
    %cst_49 = arith.constant dense<0.000000e+00> : vector<16x16xf32>
    %107 = tpu.matmul %106, %3, %cst_49 {dimension_numbers = #tpu.dot_dimension_numbers<[1], [0], [0], [1], [0, 0, 1, 1], [], []>} : vector<16x32xbf16>, vector<32x16xbf16>, vector<16x16xf32> -> vector<16x16xf32>
    %108 = vector.broadcast %4 : vector<1x16xf32> to vector<16x16xf32>
    %109 = arith.addf %107, %108 : vector<16x16xf32>
    %c16_50 = arith.constant 16 : index
    %c0_51 = arith.constant 0 : index
    %110 = vector.load %arg2[%c16_50, %c0_51] : memref<32x16xf32, #tpu.memory_space<vmem>>, vector<16x16xf32>
    %111 = arith.negf %109 : vector<16x16xf32>
    %112 = math.exp %111 : vector<16x16xf32>
    %cst_52 = arith.constant 1.000000e+00 : f32
    %113 = vector.broadcast %cst_52 : f32 to vector<16x16xf32>
    %114 = arith.addf %113, %112 : vector<16x16xf32>
    %115 = arith.divf %113, %114 : vector<16x16xf32>
    %116 = arith.mulf %115, %110 : vector<16x16xf32>
    %cst_53 = arith.constant dense<0.000000e+00> : vector<16xf32>
    %117 = vector.multi_reduction <add>, %116, %cst_53 [1] : vector<16x16xf32> to vector<16xf32>
    %118 = vector.shape_cast %117 : vector<16xf32> to vector<16x1xf32>
    %cst_54 = arith.constant dense<0.000000e+00> : vector<1xf32>
    %119 = vector.multi_reduction <add>, %118, %cst_54 [0] : vector<16x1xf32> to vector<1xf32>
    %120 = vector.shape_cast %119 : vector<1xf32> to vector<1x1xf32>
    %cst_55 = arith.constant dense<0.000000e+00> : vector<16xf32>
    %121 = vector.multi_reduction <add>, %115, %cst_55 [1] : vector<16x16xf32> to vector<16xf32>
    %122 = vector.shape_cast %121 : vector<16xf32> to vector<16x1xf32>
    %cst_56 = arith.constant dense<0.000000e+00> : vector<1xf32>
    %123 = vector.multi_reduction <add>, %122, %cst_56 [0] : vector<16x1xf32> to vector<1xf32>
    %124 = vector.shape_cast %123 : vector<1xf32> to vector<1x1xf32>
    %cst_57 = arith.constant dense<0.000000e+00> : vector<16xf32>
    %125 = vector.multi_reduction <add>, %110, %cst_57 [1] : vector<16x16xf32> to vector<16xf32>
    %126 = vector.shape_cast %125 : vector<16xf32> to vector<16x1xf32>
    %cst_58 = arith.constant dense<0.000000e+00> : vector<1xf32>
    %127 = vector.multi_reduction <add>, %126, %cst_58 [0] : vector<16x1xf32> to vector<1xf32>
    %128 = vector.shape_cast %127 : vector<1xf32> to vector<1x1xf32>
    %cst_59 = arith.constant 2.000000e+00 : f32
    %129 = vector.broadcast %cst_59 : f32 to vector<1x1xf32>
    %130 = arith.mulf %129, %120 : vector<1x1xf32>
    %cst_60 = arith.constant 9.99999997E-7 : f32
    %131 = vector.broadcast %cst_60 : f32 to vector<1x1xf32>
    %132 = arith.addf %130, %131 : vector<1x1xf32>
    %133 = arith.addf %124, %128 : vector<1x1xf32>
    %cst_61 = arith.constant 9.99999997E-7 : f32
    %134 = vector.broadcast %cst_61 : f32 to vector<1x1xf32>
    %135 = arith.addf %133, %134 : vector<1x1xf32>
    %136 = arith.divf %132, %135 : vector<1x1xf32>
    %cst_62 = arith.constant 1.000000e+00 : f32
    %137 = vector.broadcast %cst_62 : f32 to vector<1x1xf32>
    %138 = arith.subf %137, %136 : vector<1x1xf32>
    %cst_63 = arith.constant 0.000000e+00 : f32
    %139 = vector.broadcast %cst_63 : f32 to vector<16x16xf32>
    %140 = arith.cmpf ogt, %109, %139 : vector<16x16xf32>
    %141 = arith.extui %140 : vector<16x16xi1> to vector<16x16xi32>
    %142 = arith.sitofp %141 : vector<16x16xi32> to vector<16x16xf32>
    %143 = arith.mulf %142, %110 : vector<16x16xf32>
    %cst_64 = arith.constant dense<0.000000e+00> : vector<16xf32>
    %144 = vector.multi_reduction <add>, %143, %cst_64 [1] : vector<16x16xf32> to vector<16xf32>
    %145 = vector.shape_cast %144 : vector<16xf32> to vector<16x1xf32>
    %cst_65 = arith.constant dense<0.000000e+00> : vector<1xf32>
    %146 = vector.multi_reduction <add>, %145, %cst_65 [0] : vector<16x1xf32> to vector<1xf32>
    %147 = vector.shape_cast %146 : vector<1xf32> to vector<1x1xf32>
    %cst_66 = arith.constant dense<0.000000e+00> : vector<16xf32>
    %148 = vector.multi_reduction <add>, %142, %cst_66 [1] : vector<16x16xf32> to vector<16xf32>
    %149 = vector.shape_cast %148 : vector<16xf32> to vector<16x1xf32>
    %cst_67 = arith.constant dense<0.000000e+00> : vector<1xf32>
    %150 = vector.multi_reduction <add>, %149, %cst_67 [0] : vector<16x1xf32> to vector<1xf32>
    %151 = vector.shape_cast %150 : vector<1xf32> to vector<1x1xf32>
    %152 = arith.addf %151, %128 : vector<1x1xf32>
    %153 = arith.subf %152, %147 : vector<1x1xf32>
    %cst_68 = arith.constant 9.99999997E-7 : f32
    %154 = vector.broadcast %cst_68 : f32 to vector<1x1xf32>
    %155 = arith.addf %147, %154 : vector<1x1xf32>
    %cst_69 = arith.constant 9.99999997E-7 : f32
    %156 = vector.broadcast %cst_69 : f32 to vector<1x1xf32>
    %157 = arith.addf %153, %156 : vector<1x1xf32>
    %158 = arith.divf %155, %157 : vector<1x1xf32>
    %159 = arith.addf %82, %138 : vector<1x1xf32>
    %160 = arith.addf %83, %158 : vector<1x1xf32>
    %cst_70 = arith.constant 2.000000e+00 : f32
    %161 = vector.broadcast %cst_70 : f32 to vector<1x1xf32>
    %162 = arith.divf %159, %161 : vector<1x1xf32>
    %c0_71 = arith.constant 0 : index
    %c0_72 = arith.constant 0 : index
    %163 = vector.load %arg8[%c0_71, %c0_72] : memref<1x1xf32, #tpu.memory_space<vmem>>, vector<1x1xf32>
    tpu.vector_store %arg8[%c0_71, %c0_72], %162 {strides = array<i32>} : memref<1x1xf32, #tpu.memory_space<vmem>>, vector<1x1xf32>,
    %cst_73 = arith.constant 2.000000e+00 : f32
    %164 = vector.broadcast %cst_73 : f32 to vector<1x1xf32>
    %165 = arith.divf %160, %164 : vector<1x1xf32>
    %c0_74 = arith.constant 0 : index
    %c0_75 = arith.constant 0 : index
    %166 = vector.load %arg9[%c0_74, %c0_75] : memref<1x1xf32, #tpu.memory_space<vmem>>, vector<1x1xf32>
    tpu.vector_store %arg9[%c0_74, %c0_75], %165 {strides = array<i32>} : memref<1x1xf32, #tpu.memory_space<vmem>>, vector<1x1xf32>,
    return
  }
}

</mosaic_0001>

<bundles_post_ra>
// kernel: model_with_loss.1
= control target key start
LH: loop header
LB: loop body
LE: loop exit
PB: predicated region body
PF: predicated region fallthrough
CT: control target
= control target key end

     0   :  { %15 = vsyncpa [#allocation3], 0  ;;  %v881_v1 = vmov 0.0   ;;  %vm882_vm0 = vmmov 0   ;;  %s1095_s0 = inlined_call_operand.vmem [shape: bf16[32,64], index: 0, kind: input, shape index: {}]   ;;  %s1096_s1 = inlined_call_operand.vmem [shape: f32[2,32], index: 1, kind: input, shape index: {}]   ;;  %s1097_s2 = inlined_call_operand.vmem [shape: f32[32,16], index: 2, kind: input, shape index: {}]   ;;  %s1098_s3 = inlined_call_operand.vmem [shape: bf16[64,32], index: 3, kind: input, shape index: {}]   ;;  %s1099_s4 = inlined_call_operand.vmem [shape: bf16[32,32], index: 4, kind: input, shape index: {}]   ;;  %s1100_s5 = inlined_call_operand.vmem [shape: f32[1,32], index: 5, kind: input, shape index: {}]   ;;  %s1101_s6 = inlined_call_operand.vmem [shape: bf16[32,16], index: 6, kind: input, shape index: {}]   ;;  %s1102_s7 = inlined_call_operand.vmem [shape: f32[1,16], index: 7, kind: input, shape index: {}]   ;;  %s1103_s8 = inlined_call_operand.hbm [shape: f32[1,1], index: 8, kind: output, shape index: {0}]   ;;  %s1104_s9 = inlined_call_operand.hbm [shape: f32[1,1], index: 9, kind: output, shape index: {1}]  }
   0x1   :  { %v795_v0 = vld [vmem:[%s1098_s3 + $0x18] sm:$0xff]   ;;  %735 = vmatprep.subr.bf16.mxu0 %v881_v1  ;;  %747 = vmatprep.subr.bf16.mxu1 %v881_v1  ;;  %v796_v2 = vld [vmem:[%s1098_s3 + $0x10] sm:$0xff]   ;;  %v797_v3 = vld [vmem:[%s1098_s3 + $0x8] sm:$0xff]  }
   0x2   :  { %736 = vmatpush3.bf16.msra.mxu0 %v795_v0  ;;  %743 = vmatprep.mubr.msk.bf16.mxu0 %vm882_vm0, %v881_v1 }
   0x3   :  { %737 = vmatprep.subr.bf16.mxu0 %v881_v1  ;;  %751 = vmatprep.mubr.msk.bf16.mxu1 %vm882_vm0, %v881_v1 }
   0x6   :  { %738 = vmatpush3.bf16.msra.mxu0 %v796_v2 }
   0x7   :  { %739 = vmatprep.subr.bf16.mxu0 %v881_v1 }
   0x8   :  { %16 = vsyncpa [#allocation5], 0  ;;  %v798_v4 = vld [vmem:[%s1098_s3] sm:$0xff]   ;;  %vm88_vm1 = vcmask 523264   ;;  %v969_v6 = vld [vmem:[%s1099_s4 + $0x8] sm:$0xff]   ;;  %vm152_vm2 = vcmask 261120  }
   0x9   :  { %v799_v5 = vld [vmem:[%s1095_s0] sm:$0xff]   ;;  %748 = vmatpush3.bf16.msra.mxu1 %v969_v6  ;;  %v802_v8 = vld [vmem:[%s1095_s0 + $0x8] sm:$0xff]   ;;  %vm294_vm3 = vcmask 130048   ;;  %v1029_v55 = vld [vmem:[%s1097_s2 + $0x10] sm:$0xff]  ;;  %vm653_vm8 = vcmask 0   ;;  %s884_s18 = smov [#allocation4]  }
   0xa   :  { %740 = vmatpush3.bf16.msra.mxu0 %v797_v3  ;;  %749 = vmatprep.subr.bf16.mxu1 %v881_v1  ;;  %v976_v7 = vld [vmem:[%s1099_s4] sm:$0xff]   ;;  %v803_v17 = vld [vmem:[%s1101_s6 + $0x8] sm:$0xff]   ;;  %v589_v57 = vsel %vm294_vm3, %v1029_v55, 0.0  ;;  %v1043_v59 = vld [vmem:[%s1097_s2 + $0x18] sm:$0xff]  ;;  %s673_s3 = sshll.u32 %s884_s18, 4  ;;  %s674_s3 = int_to_ptr.vmem [resolvable:$true] %s673_s3 }
   0xb   :  { %741 = vmatprep.subr.bf16.mxu0 %v881_v1  ;;  %v685_v10 = vld [vmem:[%s1096_s1] ss:$0 sm:$0xff]  ;;  %v704_v22 = vld [vmem:[%s1096_s1 + $0x1] ss:$0 sm:$0xff]  ;;  %v1034_v56 = vld [vmem:[%s1097_s2 + $0x8] sm:$0xff]  ;;  %590 = vadd.xlane.f32.xlu0 %v589_v57  ;;  %v592_v60 = vsel %vm294_vm3, %v1043_v59, 0.0 }
   0xc   :  { %v804_v20 = vld [vmem:[%s1101_s6] sm:$0xff]   ;;  %v324_v58 = vsel %vm294_vm3, %v1034_v56, 0.0 }
   0xd   :  { %750 = vmatpush3.bf16.msra.mxu1 %v976_v7  ;;  %v1004_v27 = vld [vmem:[%s1097_s2] sm:$0xff]  ;;  %s883_s2 = smov [#allocation2]  }
   0xe   :  { %742 = vmatpush3.bf16.msra.mxu0 %v798_v4  ;;  %755 = vmatprep.subr.bf16.mxu1 %v881_v1  ;;  %v321_v28 = vsel %vm294_vm3, %v1004_v27, 0.0  ;;  %v1011_v29 = vld [vmem:[%s1100_s5] ss:$0 sm:$0xff] }
   0xf   :  { %763 = vmatprep.subr.bf16.mxu0 %v881_v1  ;;  %322 = vadd.xlane.f32.xlu1 %v321_v28  ;;  %v1050_v61 = vld [vmem:[%s1102_s7] ss:$0 sm:$0xff]  ;;  %s663_s7 = sshll.u32 %s883_s2, 4  ;;  %s664_s7 = int_to_ptr.vmem [resolvable:$true] %s663_s7 }
  0x10   :  { %s837_s19 = scalar_lea.vmem %s664_s7, 16  ;;  %s841_s20 = scalar_lea.vmem %s664_s7, 32 }
  0x11   :  { %744 = vmatmul.mubr.msk.bf16.vlgmr.msra.gmra.mxu0 %vm88_vm1, %v799_v5  ;;  %p838_p0 = scmp.ne.s32.totalorder %s664_s7, %s837_s19  ;;  %p842_p1 = scmp.lt.s32.totalorder %s664_s7, %s664_s7 }
  0x12   :  { %764 = vmatpush3.bf16.msra.mxu0 %v795_v0  ;;  %771 = vmatprep.mubr.msk.bf16.mxu0 %vm882_vm0, %v881_v1  ;;  %p843_p2 = scmp.lt.s32.totalorder %s841_s20, %s837_s19 }
  0x13   :  { %765 = vmatprep.subr.bf16.mxu0 %v881_v1  ;;  %325 = vadd.xlane.f32.xlu1 %v324_v58 }
  0x14   :  { %p844_p3 = por %p843_p2, %p842_p1 }
  0x16   :  { %766 = vmatpush3.bf16.msra.mxu0 %v796_v2  ;;  %p845_p4 = pnand %p844_p3, %p838_p0 }
  0x17   :  { %767 = vmatprep.subr.bf16.mxu0 %v881_v1  ;;  %593 = vadd.xlane.f32.xlu1 %v592_v60 }
  0x1a   :  { %768 = vmatpush3.bf16.msra.mxu0 %v797_v3 }
  0x1b   :  { %769 = vmatprep.subr.bf16.mxu0 %v881_v1 }
  0x1e   :  { %770 = vmatpush3.bf16.msra.mxu0 %v798_v4 }
  0x21   :  { %772 = vmatmul.mubr.msk.bf16.vlgmr.msra.gmra.mxu0 %vm88_vm1, %v802_v8 }
  0xd1   :  { %v126_v9 = vpop.f32.mrf.mxu0 }
  0xd2   :  { %v127_v13 = vadd.f32 %v685_v10, %v126_v9 }
  0xd3   :  { %v745_v11 = vpop.f32.mrf.mxu0 }
  0xd5   :  { %v129_v12 = vpop.f32.mrf.mxu0 }
  0xd6   :  { %v130_v14 = vadd.f32 %v685_v10, %v129_v12 }
  0xd7   :  { %v746_v15 = vpop.f32.mrf.mxu0 }
  0xd8   :  { %v133_v16 = vpack.c.bf16 %v130_v14, %v127_v13 }
  0xda   :  { %752 = vmatmul.mubr.msk.bf16.vlgmr.msra.gmra.mxu1 %vm152_vm2, %v133_v16 }
  0xdb   :  { %759 = vmatprep.mubr.msk.bf16.mxu1 %vm882_vm0, %v881_v1  ;;  %756 = vmatpush3.bf16.msra.mxu1 %v803_v17 }
  0xdc   :  { %757 = vmatprep.subr.bf16.mxu1 %v881_v1 }
  0xdf   :  { %758 = vmatpush3.bf16.msra.mxu1 %v804_v20 }
  0xe0   :  { %775 = vmatprep.subr.bf16.mxu1 %v881_v1 }
  0xe1   :  { %v432_v18 = vpop.f32.mrf.mxu0 }
  0xe2   :  { %v433_v23 = vadd.f32 %v704_v22, %v432_v18 }
  0xe3   :  { %v773_v19 = vpop.f32.mrf.mxu0 }
  0xe5   :  { %v435_v21 = vpop.f32.mrf.mxu0 }
  0xe6   :  { %v436_v24 = vadd.f32 %v704_v22, %v435_v21 }
  0xe7   :  { %v774_v25 = vpop.f32.mrf.mxu0 }
  0xe8   :  { %v439_v26 = vpack.c.bf16 %v436_v24, %v433_v23 }
 0x19a   :  { %v190_v30 = vpop.f32.mrf.mxu1 }
 0x19b   :  { %v191_v31 = vadd.f32 %v1011_v29, %v190_v30 }
 0x19c   :  { %v753_v32 = vpop.f32.mrf.mxu1 }
 0x19d   :  { %v197_v33 = vmul.f32 %v191_v31, %v191_v31 }
 0x19e   :  { %v193_v34 = vpop.f32.mrf.mxu1 }
 0x19f   :  { %v199_v35 = vmul.f32 %v197_v33, %v191_v31  ;;  %v194_v36 = vadd.f32 %v1011_v29, %v193_v34 }
 0x1a0   :  { %v754_v37 = vpop.f32.mrf.mxu1 }
 0x1a1   :  { %v201_v38 = vmul.f32 0.044715, %v199_v35  ;;  %v198_v39 = vmul.f32 %v194_v36, %v194_v36 }
 0x1a3   :  { %v203_v40 = vadd.f32 %v201_v38, %v191_v31  ;;  %v200_v41 = vmul.f32 %v198_v39, %v194_v36 }
 0x1a5   :  { %v205_v42 = vmul.f32 0.7978846, %v203_v40  ;;  %v202_v43 = vmul.f32 0.044715, %v200_v41 }
 0x1a7   :  { %805 = vtanh.f32 %v205_v42  ;;  %v204_v44 = vadd.f32 %v202_v43, %v194_v36 }
 0x1a9   :  { %v206_v45 = vmul.f32 0.7978846, %v204_v44 }
 0x1ab   :  { %807 = vtanh.f32 %v206_v45 }
 0x1b4   :  { %v806_v46 = vpop.eup %805 }
 0x1b5   :  { %v209_v47 = vadd.f32 1.0, %v806_v46 }
 0x1b7   :  { %v211_v49 = vmul.f32 0.5, %v209_v47 }
 0x1b8   :  { %v808_v48 = vpop.eup %807 }
 0x1b9   :  { %v210_v50 = vadd.f32 1.0, %v808_v48  ;;  %v213_v52 = vmul.f32 %v211_v49, %v191_v31 }
 0x1bb   :  { %v212_v51 = vmul.f32 0.5, %v210_v50 }
 0x1bd   :  { %v214_v53 = vmul.f32 %v212_v51, %v194_v36 }
 0x1bf   :  { %v215_v54 = vpack.c.bf16 %v214_v53, %v213_v52 }
 0x1c1   :  { %760 = vmatmul.mubr.msk.bf16.vlgmr.msra.gmra.mxu1 %vm152_vm2, %v215_v54 }
 0x1c2   :  { %776 = vmatpush3.bf16.msra.mxu1 %v969_v6  ;;  %779 = vmatprep.mubr.msk.bf16.mxu1 %vm882_vm0, %v881_v1 }
 0x1c3   :  { %777 = vmatprep.subr.bf16.mxu1 %v881_v1 }
 0x1c6   :  { %778 = vmatpush3.bf16.msra.mxu1 %v976_v7 }
 0x1c7   :  { %783 = vmatprep.subr.bf16.mxu1 %v881_v1 }
 0x1c9   :  { %780 = vmatmul.mubr.msk.bf16.vlgmr.msra.gmra.mxu1 %vm152_vm2, %v439_v26 }
 0x1ca   :  { %784 = vmatpush3.bf16.msra.mxu1 %v803_v17  ;;  %787 = vmatprep.mubr.msk.bf16.mxu1 %vm882_vm0, %v881_v1 }
 0x1cb   :  { %785 = vmatprep.subr.bf16.mxu1 %v881_v1 }
 0x1ce   :  { %786 = vmatpush3.bf16.msra.mxu1 %v804_v20 }
 0x281   :  { %v271_v62 = vpop.f32.mrf.mxu1 }
 0x282   :  { %v272_v63 = vadd.f32 %v1050_v61, %v271_v62 }
 0x283   :  { %v761_v0 = vpop.f32.mrf.mxu1 }
 0x284   :  { %v700_v2 = vmul.f32 -1.442695, %v272_v63  ;;  %vm341_vm4 = vcmp.gt.f32.partialorder %v272_v63, 0.0 }
 0x285   :  { %v274_v3 = vpop.f32.mrf.mxu1  ;;  %v702_v4 = vsel %vm341_vm4, 1.0, %v881_v1 }
 0x286   :  { %809 = vpow2.f32 %v700_v2  ;;  %v275_v5 = vadd.f32 %v1050_v61, %v274_v3  ;;  %v362_v6 = vsel %vm294_vm3, %v702_v4, 0.0  ;;  %v347_v7 = vmul.f32 %v702_v4, %v1004_v27 }
 0x287   :  { %363 = vadd.xlane.f32.xlu0 %v362_v6  ;;  %v762_v8 = vpop.f32.mrf.mxu1 }
 0x288   :  { %v701_v9 = vmul.f32 -1.442695, %v275_v5  ;;  %vm342_vm5 = vcmp.gt.f32.partialorder %v275_v5, 0.0  ;;  %v349_v11 = vsel %vm294_vm3, %v347_v7, 0.0 }
 0x289   :  { %v477_v10 = vpop.f32.mrf.mxu1  ;;  %v703_v12 = vsel %vm342_vm5, 1.0, %v881_v1 }
 0x28a   :  { %811 = vpow2.f32 %v701_v9  ;;  %v478_v13 = vadd.f32 %v1011_v29, %v477_v10  ;;  %v365_v14 = vsel %vm294_vm3, %v703_v12, 0.0  ;;  %v348_v15 = vmul.f32 %v703_v12, %v1034_v56 }
 0x28b   :  { %350 = vadd.xlane.f32.xlu0 %v349_v11  ;;  %366 = vadd.xlane.f32.xlu1 %v365_v14  ;;  %v781_v16 = vpop.f32.mrf.mxu1 }
 0x28c   :  { %v484_v17 = vmul.f32 %v478_v13, %v478_v13  ;;  %v352_v21 = vsel %vm294_vm3, %v348_v15, 0.0 }
 0x28d   :  { %v480_v18 = vpop.f32.mrf.mxu1 }
 0x28e   :  { %v486_v19 = vmul.f32 %v484_v17, %v478_v13  ;;  %v481_v20 = vadd.f32 %v1011_v29, %v480_v18 }
 0x28f   :  { %353 = vadd.xlane.f32.xlu1 %v352_v21  ;;  %v782_v22 = vpop.f32.mrf.mxu1 }
 0x290   :  { %v488_v23 = vmul.f32 0.044715, %v486_v19  ;;  %v485_v24 = vmul.f32 %v481_v20, %v481_v20  ;;  %v591_v19 = vpop.xlane.xlu0 %590 }
 0x292   :  { %v490_v25 = vadd.f32 %v488_v23, %v478_v13  ;;  %v487_v26 = vmul.f32 %v485_v24, %v481_v20 }
 0x293   :  { %v810_v28 = vpop.eup %809 }
 0x294   :  { %v286_v30 = vadd.f32 1.0, %v810_v28  ;;  %v492_v31 = vmul.f32 0.7978846, %v490_v25  ;;  %v489_v32 = vmul.f32 0.044715, %v487_v26 }
 0x296   :  { %813 = vrcp.f32 %v286_v30  ;;  %v491_v33 = vadd.f32 %v489_v32, %v481_v20 }
 0x297   :  { %v812_v34 = vpop.eup %811  ;;  %815 = vtanh.f32 %v492_v31 }
 0x298   :  { %v287_v35 = vadd.f32 1.0, %v812_v34  ;;  %v493_v36 = vmul.f32 0.7978846, %v491_v33 }
 0x29a   :  { %817 = vrcp.f32 %v287_v35 }
 0x29b   :  { %819 = vtanh.f32 %v493_v36 }
 0x2a3   :  { %v814_v29 = vpop.eup %813 }
 0x2a4   :  { %v816_v37 = vpop.eup %815  ;;  %v308_v38 = vsel %vm294_vm3, %v814_v29, 0.0  ;;  %v292_v10 = vmul.f32 %v814_v29, %v1004_v27 }
 0x2a5   :  { %v496_v39 = vadd.f32 1.0, %v816_v37  ;;  %309 = vadd.xlane.f32.xlu0 %v308_v38 }
 0x2a6   :  { %v295_v12 = vsel %vm294_vm3, %v292_v10, 0.0 }
 0x2a7   :  { %v818_v40 = vpop.eup %817  ;;  %v498_v43 = vmul.f32 0.5, %v496_v39 }
 0x2a8   :  { %v820_v41 = vpop.eup %819  ;;  %v311_v42 = vsel %vm294_vm3, %v818_v40, 0.0  ;;  %v293_v15 = vmul.f32 %v818_v40, %v1034_v56 }
 0x2a9   :  { %v497_v44 = vadd.f32 1.0, %v820_v41  ;;  %312 = vadd.xlane.f32.xlu0 %v311_v42  ;;  %v500_v46 = vmul.f32 %v498_v43, %v478_v13 }
 0x2aa   :  { %v298_v17 = vsel %vm294_vm3, %v293_v15, 0.0 }
 0x2ab   :  { %v499_v45 = vmul.f32 0.5, %v497_v44 }
 0x2ad   :  { %v501_v47 = vmul.f32 %v499_v45, %v481_v20  ;;  %v323_v20 = vpop.xlane.xlu1 %322 }
 0x2af   :  { %v502_v48 = vpack.c.bf16 %v501_v47, %v500_v46 }
 0x2b1   :  { %788 = vmatmul.mubr.msk.bf16.vlgmr.msra.gmra.mxu1 %vm152_vm2, %v502_v48  ;;  %v326_v22 = vpop.xlane.xlu1 %325 }
 0x2b2   :  { %v327_v30 = vadd.f32 %v326_v22, %v323_v20 }
 0x2b4   :  { %v328_v34 = vrot.slane %v327_v30, 4 }
 0x2b5   :  { %v594_v23 = vpop.xlane.xlu1 %593 }
 0x2b6   :  { %v595_v29 = vadd.f32 %v594_v23, %v591_v19  ;;  %v329_v40 = vadd.f32 %v328_v34, %v327_v30 }
 0x2b8   :  { %v596_v42 = vrot.slane %v595_v29, 4  ;;  %v330_v46 = vrot.slane %v329_v40, 2 }
 0x2ba   :  { %v597_v48 = vadd.f32 %v596_v42, %v595_v29 }
 0x310   :  { %v364_v21 = vpop.xlane.xlu0 %363 }
 0x314   :  { %v367_v24 = vpop.xlane.xlu1 %366 }
 0x315   :  { %v368_v31 = vadd.f32 %v367_v24, %v364_v21 }
 0x317   :  { %v369_v35 = vrot.slane %v368_v31, 4 }
 0x318   :  { %v354_v28 = vpop.xlane.xlu1 %353 }
 0x319   :  { %v370_v41 = vadd.f32 %v369_v35, %v368_v31 }
 0x31b   :  { %v371_v47 = vrot.slane %v370_v41, 2 }
 0x371   :  { %v540_v49 = vpop.f32.mrf.mxu1 }
 0x372   :  { %v541_v50 = vadd.f32 %v1050_v61, %v540_v49 }
 0x373   :  { %v789_v51 = vpop.f32.mrf.mxu1 }
 0x374   :  { %v709_v52 = vmul.f32 -1.442695, %v541_v50  ;;  %vm609_vm6 = vcmp.gt.f32.partialorder %v541_v50, 0.0 }
 0x375   :  { %v543_v53 = vpop.f32.mrf.mxu1  ;;  %v711_v54 = vsel %vm609_vm6, 1.0, %v881_v1 }
 0x376   :  { %821 = vpow2.f32 %v709_v52  ;;  %v544_v57 = vadd.f32 %v1050_v61, %v543_v53  ;;  %v630_v58 = vsel %vm294_vm3, %v711_v54, 0.0  ;;  %v615_v7 = vmul.f32 %v711_v54, %v1029_v55 }
 0x377   :  { %631 = vadd.xlane.f32.xlu0 %v630_v58  ;;  %v790_v60 = vpop.f32.mrf.mxu1  ;;  %v331_v53 = vadd.f32 %v330_v46, %v329_v40  ;;  %v372_v54 = vadd.f32 %v371_v47, %v370_v41 }
 0x378   :  { %v710_v62 = vmul.f32 -1.442695, %v544_v57  ;;  %vm610_vm7 = vcmp.gt.f32.partialorder %v544_v57, 0.0  ;;  %v617_v9 = vsel %vm294_vm3, %v615_v7, 0.0  ;;  %v598_v57 = vrot.slane %v597_v48, 2 }
 0x379   :  { %v712_v63 = vsel %vm610_vm7, 1.0, %v881_v1 }
 0x37a   :  { %823 = vpow2.f32 %v710_v62  ;;  %v633_v0 = vsel %vm294_vm3, %v712_v63, 0.0  ;;  %v616_v11 = vmul.f32 %v712_v63, %v1043_v59 }
 0x37b   :  { %634 = vadd.xlane.f32.xlu1 %v633_v0 }
 0x37c   :  { %v620_v13 = vsel %vm294_vm3, %v616_v11, 0.0 }
 0x383   :  { %v822_v2 = vpop.eup %821 }
 0x384   :  { %v555_v3 = vadd.f32 1.0, %v822_v2 }
 0x386   :  { %825 = vrcp.f32 %v555_v3  ;;  %v332_v3 = vrot.slane %v331_v53, 1 }
 0x387   :  { %v824_v4 = vpop.eup %823 }
 0x388   :  { %v556_v5 = vadd.f32 1.0, %v824_v4  ;;  %v373_v4 = vrot.slane %v372_v54, 1  ;;  %v333_v11 = vadd.f32 %v332_v3, %v331_v53 }
 0x38a   :  { %827 = vrcp.f32 %v556_v5 }
 0x393   :  { %v826_v6 = vpop.eup %825 }
 0x394   :  { %v576_v61 = vsel %vm294_vm3, %v826_v6, 0.0  ;;  %v561_v14 = vmul.f32 %v826_v6, %v1029_v55  ;;  %v351_v55 = vpop.xlane.xlu0 %350  ;;  %v599_v6 = vadd.f32 %v598_v57, %v597_v48 }
 0x395   :  { %577 = vadd.xlane.f32.xlu0 %v576_v61  ;;  %v355_v32 = vadd.f32 %v354_v28, %v351_v55 }
 0x396   :  { %v563_v16 = vsel %vm294_vm3, %v561_v14, 0.0 }
 0x397   :  { %v828_v8 = vpop.eup %827  ;;  %v356_v37 = vrot.slane %v355_v32, 4 }
 0x398   :  { %v579_v1 = vsel %vm294_vm3, %v828_v8, 0.0  ;;  %v562_v27 = vmul.f32 %v828_v8, %v1043_v59  ;;  %v310_v56 = vpop.xlane.xlu0 %309 }
 0x399   :  { %618 = vadd.xlane.f32.xlu0 %v617_v9  ;;  %580 = vadd.xlane.f32.xlu1 %v579_v1  ;;  %v357_v43 = vadd.f32 %v356_v37, %v355_v32 }
 0x39a   :  { %v566_v18 = vsel %vm294_vm3, %v562_v27, 0.0 }
 0x39b   :  { %v358_v49 = vrot.slane %v357_v43, 2 }
 0x39c   :  { %v313_v25 = vpop.xlane.xlu0 %312 }
 0x39d   :  { %296 = vadd.xlane.f32.xlu0 %v295_v12  ;;  %621 = vadd.xlane.f32.xlu1 %v620_v13  ;;  %v314_v26 = vadd.f32 %v313_v25, %v310_v56  ;;  %v359_v58 = vadd.f32 %v358_v49, %v357_v43  ;;  %v374_v12 = vadd.f32 %v373_v4, %v372_v54 }
 0x39f   :  { %v315_v59 = vrot.slane %v314_v26, 4  ;;  %v360_v61 = vrot.slane %v359_v58, 1  ;;  %v375_v55 = vadd.f32 %v374_v12, %v333_v11 }
 0x3a1   :  { %564 = vadd.xlane.f32.xlu0 %v563_v16  ;;  %299 = vadd.xlane.f32.xlu1 %v298_v17  ;;  %v316_v38 = vadd.f32 %v315_v59, %v314_v26  ;;  %v600_v16 = vrot.slane %v599_v6, 1  ;;  %v361_v17 = vadd.f32 %v360_v61, %v359_v58 }
 0x3a3   :  { %v317_v44 = vrot.slane %v316_v38, 2  ;;  %v601_v25 = vadd.f32 %v600_v16, %v599_v6  ;;  %v376_v26 = vsub.f32 %v375_v55, %v361_v17  ;;  %v377_v3 = vadd.f32 1e-06, %v361_v17 }
 0x3a5   :  { %567 = vadd.xlane.f32.xlu1 %v566_v18  ;;  %v318_v50 = vadd.f32 %v317_v44, %v316_v38 }
 0x3a7   :  { %v319_v60 = vrot.slane %v318_v50, 1 }
 0x3a9   :  { %v320_v7 = vadd.f32 %v319_v60, %v318_v50 }
 0x3ab   :  { %v336_v27 = vadd.f32 %v333_v11, %v320_v7 }
 0x3ad   :  { %v337_v28 = vadd.f32 1e-06, %v336_v27 }
 0x3af   :  { %829 = vrcp.f32 %v337_v28 }
 0x3bc   :  { %v830_v58 = vpop.eup %829 }
 0x400   :  { %v632_v36 = vpop.xlane.xlu0 %631 }
 0x404   :  { %v635_v33 = vpop.xlane.xlu1 %634 }
 0x405   :  { %v636_v39 = vadd.f32 %v635_v33, %v632_v36 }
 0x407   :  { %v637_v45 = vrot.slane %v636_v39, 4 }
 0x409   :  { %v638_v51 = vadd.f32 %v637_v45, %v636_v39  ;;  %v378_v39 = vadd.f32 1e-06, %v376_v26 }
 0x40b   :  { %v639_v62 = vrot.slane %v638_v51, 2 }
 0x40d   :  { %v640_v8 = vadd.f32 %v639_v62, %v638_v51 }
 0x40f   :  { %v641_v18 = vrot.slane %v640_v8, 1 }
 0x411   :  { %v642_v30 = vadd.f32 %v641_v18, %v640_v8 }
 0x413   :  { %v643_v40 = vadd.f32 %v642_v30, %v601_v25 }
 0x41e   :  { %v578_v52 = vpop.xlane.xlu0 %577 }
 0x422   :  { %v619_v63 = vpop.xlane.xlu0 %618  ;;  %v581_v0 = vpop.xlane.xlu1 %580 }
 0x423   :  { %v582_v2 = vadd.f32 %v581_v0, %v578_v52 }
 0x425   :  { %v583_v5 = vrot.slane %v582_v2, 4 }
 0x426   :  { %v622_v9 = vpop.xlane.xlu1 %621  ;;  %v297_v13 = vpop.xlane.xlu0 %296 }
 0x427   :  { %v584_v1 = vadd.f32 %v583_v5, %v582_v2  ;;  %v623_v10 = vadd.f32 %v622_v9, %v619_v63 }
 0x429   :  { %v585_v14 = vrot.slane %v584_v1, 2  ;;  %v624_v15 = vrot.slane %v623_v10, 4 }
 0x42a   :  { %v300_v19 = vpop.xlane.xlu1 %299  ;;  %v565_v31 = vpop.xlane.xlu0 %564 }
 0x42b   :  { %v586_v20 = vadd.f32 %v585_v14, %v584_v1  ;;  %v625_v21 = vadd.f32 %v624_v15, %v623_v10  ;;  %v301_v22 = vadd.f32 %v300_v19, %v297_v13 }
 0x42d   :  { %v587_v23 = vrot.slane %v586_v20, 1  ;;  %v626_v56 = vrot.slane %v625_v21, 2  ;;  %v302_v24 = vrot.slane %v301_v22, 4 }
 0x42e   :  { %v568_v32 = vpop.xlane.xlu1 %567 }
 0x42f   :  { %v588_v59 = vadd.f32 %v587_v23, %v586_v20  ;;  %v627_v33 = vadd.f32 %v626_v56, %v625_v21  ;;  %v303_v34 = vadd.f32 %v302_v24, %v301_v22  ;;  %v569_v35 = vadd.f32 %v568_v32, %v565_v31 }
 0x431   :  { %v604_v36 = vadd.f32 %v601_v25, %v588_v59  ;;  %v628_v29 = vrot.slane %v627_v33, 1  ;;  %v304_v37 = vrot.slane %v303_v34, 2  ;;  %v570_v38 = vrot.slane %v569_v35, 4 }
 0x433   :  { %v605_v41 = vadd.f32 1e-06, %v604_v36  ;;  %v629_v42 = vadd.f32 %v628_v29, %v627_v33  ;;  %v305_v43 = vadd.f32 %v304_v37, %v303_v34  ;;  %v571_v44 = vadd.f32 %v570_v38, %v569_v35 }
 0x435   :  { %831 = vrcp.f32 %v605_v41  ;;  %v644_v45 = vsub.f32 %v643_v40, %v629_v42  ;;  %v306_v46 = vrot.slane %v305_v43, 1  ;;  %v572_v47 = vrot.slane %v571_v44, 2 }
 0x436   :  { %833 = vrcp.f32 %v378_v39  ;;  %v645_v6 = vadd.f32 1e-06, %v629_v42 }
 0x437   :  { %v646_v48 = vadd.f32 1e-06, %v644_v45  ;;  %v307_v49 = vadd.f32 %v306_v46, %v305_v43  ;;  %v573_v50 = vadd.f32 %v572_v47, %v571_v44 }
 0x439   :  { %835 = vrcp.f32 %v646_v48  ;;  %v334_v51 = vmul.f32 2.0, %v307_v49  ;;  %v574_v52 = vrot.slane %v573_v50, 1 }
 0x43b   :  { %v575_v53 = vadd.f32 %v574_v52, %v573_v50  ;;  %v335_v57 = vadd.f32 1e-06, %v334_v51 }
 0x43d   :  { %v602_v54 = vmul.f32 2.0, %v575_v53  ;;  %v339_v60 = vmul.f32 %v830_v58, %v335_v57 }
 0x43f   :  { %v603_v62 = vadd.f32 1e-06, %v602_v54  ;;  %v340_v4 = vsub.f32 1.0, %v339_v60 }
 0x442   :  { %v832_v63 = vpop.eup %831 }
 0x443   :  { %v607_v0 = vmul.f32 %v832_v63, %v603_v62  ;;  %v834_v2 = vpop.eup %833 }
 0x444   :  { %v380_v8 = vmul.f32 %v834_v2, %v377_v3 }
 0x445   :  { %v608_v5 = vsub.f32 1.0, %v607_v0 }
 0x446   :  { %v836_v61 = vpop.eup %835 }
 0x447   :  { %v649_v7 = vadd.f32 %v608_v5, %v340_v4  ;;  %v648_v9 = vmul.f32 %v836_v61, %v645_v6 }
 0x449   :  { %v652_v1 = vmul.f32 0.5, %v649_v7  ;;  %v650_v10 = vadd.f32 %v648_v9, %v380_v8 }
 0x44b   :  { %654 = vst.msk [vmem:[#allocation2] sm:$0x1] %vm653_vm8, %v652_v1  ;;  %v655_v11 = vmul.f32 0.5, %v650_v10 }
 0x44c   :  { %848 = shalt.err (!%p845_p4)
}
 0x44d   :  { %666 = dma.vmem_to_hbm [thread:$0]  %s664_s7, 16, %s1103_s8, [#allocation3]   ;;  %656 = vst.msk [vmem:[#allocation4] sm:$0x1] %vm653_vm8, %v655_v11 }
 0x44e   :  { %s857_s23 = scalar_lea.vmem %s674_s3, 16  ;;  %s861_s24 = scalar_lea.vmem %s674_s3, 32 }
 0x44f   :  { %p858_p5 = scmp.ne.s32.totalorder %s674_s3, %s857_s23  ;;  %p862_p6 = scmp.lt.s32.totalorder %s674_s3, %s674_s3 }
 0x450   :  { %p863_p7 = scmp.lt.s32.totalorder %s861_s24, %s857_s23 }
 0x452   :  { %p864_p8 = por %p863_p7, %p862_p6 }
 0x454   :  { %p865_p9 = pnand %p864_p8, %p858_p5 }
 0x456   :  { %868 = shalt.err (!%p865_p9)
}
 0x457   :  { %676 = dma.vmem_to_hbm [thread:$0]  %s674_s3, 16, %s1104_s9, [#allocation5]  }
 0x458   :  { %877 = dma.done.wait [#allocation3], 16  }
 0x459   :  { %878 = vsyncadd [#allocation3], 4294967280 }
 0x45a   :  { %879 = dma.done.wait [#allocation5], 16  }
 0x45b   :  { %880 = vsyncadd [#allocation5], 4294967280 }
 0x45c   :  { %683 = vsyncpa [#allocation3], 1 }
 0x45d   :  { %684 = vsyncpa [#allocation5], 1 }

</bundles_post_ra>
